<compile_context>
chip_gen: v7x
topology: tpu7x:2x2x1
jax: 0.10.0
libtpu: 0.0.40
codegen_flags: <defaults>
</compile_context>

<pallas_src>
import jax
import jax.numpy as jnp
from jax.experimental import pallas as pl
from jax.experimental.pallas import tpu as pltpu

_MIB = 1024 * 1024


def _round_up(x, m):
    return ((x + m - 1) // m) * m


# ---------------------------------------------------------------------------
# Kernel: out = relu(relu(x @ W1 + b1) @ W2 + b2) @ W3 + b3
# ---------------------------------------------------------------------------
def mlp_kernel(x_ref, w1_ref, b1_ref, w2_ref, b2_ref, w3_ref, b3_ref, o_ref):
    # x arrives in its native f32; cast to bf16 in-kernel (cheap VPU work that
    # rides under the MXU) instead of paying a separate XLA cast/pad pass.
    x = x_ref[...].astype(w1_ref.dtype)

    # Layer 1: bf16 MXU matmul with f32 accumulation; bias + ReLU in f32 (VPU).
    h1 = jnp.dot(x, w1_ref[...], preferred_element_type=jnp.float32)
    h1 = jnp.maximum(h1 + b1_ref[...], 0.0)

    # Layer 2.
    h2 = jnp.dot(h1.astype(w2_ref.dtype), w2_ref[...],
                 preferred_element_type=jnp.float32)
    h2 = jnp.maximum(h2 + b2_ref[...], 0.0)

    # Layer 3 (no activation). Class dim is padded to a multiple of 128 in
    # prepare_params -> unmasked, lane-dense stores here.
    out = jnp.dot(h2.astype(w3_ref.dtype), w3_ref[...],
                  preferred_element_type=jnp.float32)
    o_ref[...] = (out + b3_ref[...]).astype(o_ref.dtype)


# ---------------------------------------------------------------------------
# One-time parameter setup (do NOT call per forward pass).
# ---------------------------------------------------------------------------
def prepare_params(params):
    """Cast matmul operands to bf16 and zero-pad the class dim to a lane-dense
    multiple of 128.  Hoisted out of the per-call path."""
    w1, b1 = params["w1"], params["b1"]
    w2, b2 = params["w2"], params["b2"]
    w3, b3 = params["w3"], params["b3"]
    hidden, num_classes = w3.shape
    c_pad = _round_up(num_classes, 128)

    w3_p = jnp.zeros((hidden, c_pad), jnp.bfloat16).at[:, :num_classes].set(
        w3.astype(jnp.bfloat16))
    b3_p = jnp.zeros((1, c_pad), jnp.float32).at[:, :num_classes].set(
        b3.reshape(1, -1).astype(jnp.float32))
    return {
        "w1": w1.astype(jnp.bfloat16),
        "b1": b1.reshape(1, -1).astype(jnp.float32),
        "w2": w2.astype(jnp.bfloat16),
        "b2": b2.reshape(1, -1).astype(jnp.float32),
        "w3": w3_p,
        "b3": b3_p,
        "num_classes": num_classes,
    }


def _choose_block_batch(batch, block_batch):
    # Small / medium batches: one grid step over the full batch (no padding of
    # x, minimal launch overhead -- the demo shapes are purely overhead-bound).
    if batch < 512:
        return batch
    # Large batches: tiles that are multiples of 256 (full MXU-height passes on
    # v6e/v7x) and at least 2 grid steps so the "parallel" batch axis can be
    # sharded across both TensorCores on v7x.
    half = -(-batch // 2)
    return max(256, min(block_batch, _round_up(half, 256)))


# ---------------------------------------------------------------------------
# Forward pass.
# ---------------------------------------------------------------------------
def neural_net_forward(x, prep, *, block_batch=512, out_dtype=jnp.float32):
    """x: (B, input_size) float32.  prep: output of prepare_params()."""
    w1, b1 = prep["w1"], prep["b1"]
    w2, b2 = prep["w2"], prep["b2"]
    w3, b3 = prep["w3"], prep["b3"]
    num_classes = prep["num_classes"]

    B, d_in = x.shape
    hidden = w1.shape[1]
    c_pad = w3.shape[1]

    bm = _choose_block_batch(B, block_batch)
    b_pad = _round_up(B, bm)
    x_in = x
    if b_pad != B:
        # Ragged last tile only (large-batch path); keep x's native dtype --
        # the bf16 cast stays in-kernel, no full-array cast pass materialized.
        x_in = jnp.zeros((b_pad, d_in), x.dtype).at[:B].set(x)
    grid = (b_pad // bm,)

    # ---- rooflines / budgets -------------------------------------------
    out_itemsize = jnp.dtype(out_dtype).itemsize
    flops = 2 * b_pad * (d_in * hidden + hidden * hidden + hidden * c_pad)
    bytes_accessed = (
        x_in.size * x_in.dtype.itemsize
        + (w1.size + w2.size + w3.size) * 2
        + (b1.size + b2.size + b3.size) * 4
        + b_pad * c_pad * out_itemsize)
    # Single-buffered resident weights + double-buffered x/out tiles + f32
    # intermediates, sized against the v7x 64 MiB VMEM ceiling.
    vmem_est = (
        (w1.size + w2.size + w3.size) * 2
        + (b1.size + b2.size + b3.size) * 4
        + 2 * bm * d_in * x.dtype.itemsize
        + 2 * bm * c_pad * out_itemsize
        + 3 * bm * hidden * 4)
    vmem_limit = int(min(64 * _MIB, max(32 * _MIB, int(vmem_est * 1.5))))

    def make_call(single_buffer_weights):
        if single_buffer_weights:
            # Weights are fetched once (constant index_map); Buffered(1) drops
            # the default 2-deep pipeline so they cost 1x (not 2x) VMEM.
            def const(shape):
                return pl.BlockSpec(shape, lambda i: (0, 0),
                                    pipeline_mode=pl.Buffered(1))
        else:
            def const(shape):
                return pl.BlockSpec(shape, lambda i: (0, 0))
        return pl.pallas_call(
            mlp_kernel,
            out_shape=jax.ShapeDtypeStruct((b_pad, c_pad), out_dtype),
            grid=grid,
            in_specs=[
                pl.BlockSpec((bm, d_in), lambda i: (i, 0)),  # x tile, pipelined
                const((d_in, hidden)),                       # W1 (VMEM resident)
                const((1, hidden)),                          # b1
                const((hidden, hidden)),                     # W2
                const((1, hidden)),                          # b2
                const((hidden, c_pad)),                      # W3 (class-padded)
                const((1, c_pad)),                           # b3 (class-padded)
            ],
            out_specs=pl.BlockSpec((bm, c_pad), lambda i: (i, 0)),
            compiler_params=pltpu.CompilerParams(
                dimension_semantics=("parallel",),           # dual-TC on v7x
                vmem_limit_bytes=vmem_limit),
            cost_estimate=pl.CostEstimate(
                flops=flops, transcendentals=0, bytes_accessed=bytes_accessed),
        )

    args = (x_in, w1, b1, w2, b2, w3, b3)
    try:
        out_padded = make_call(single_buffer_weights=True)(*args)
    except Exception:
        # Fallback for builds that reject single-buffered block specs; this is
        # the previously verified-clean double-buffered configuration.
        out_padded = make_call(single_buffer_weights=False)(*args)

    # NOTE: the all-resident weight design caps hidden at roughly ~4K on v7x
    # (64 MiB VMEM); beyond that, add a K-reduction grid axis over `hidden`
    # for layers 2/3 with an f32 VMEM accumulator (pl.when init/finalize).
    # Strip batch/class padding (padded columns are exact zeros, never leak).
    return out_padded[:B, :num_classes]


# ---------------------------------------------------------------------------
# Deterministic init mimicking nn.Linear (uniform(-1/sqrt(fan_in), +1/sqrt)).
# ---------------------------------------------------------------------------
def init_params(key, input_size, hidden_size, num_classes):
    ks = jax.random.split(key, 6)

    def linear(kw, kb, fan_in, fan_out):
        bound = 1.0 / jnp.sqrt(fan_in)
        # PyTorch weight is (out, in); store transposed as (in, out) for x @ W.
        w = jax.random.uniform(kw, (fan_in, fan_out), jnp.float32, -bound, bound)
        b = jax.random.uniform(kb, (1, fan_out), jnp.float32, -bound, bound)
        return w, b

    w1, b1 = linear(ks[0], ks[1], input_size, hidden_size)
    w2, b2 = linear(ks[2], ks[3], hidden_size, hidden_size)
    w3, b3 = linear(ks[4], ks[5], hidden_size, num_classes)
    return {"w1": w1, "b1": b1, "w2": w2, "b2": b2, "w3": w3, "b3": b3}


if __name__ == "__main__":
    key = jax.random.PRNGKey(0)
    k_x, k_p = jax.random.split(key)

    batch, input_size, hidden_size, num_classes = 8, 32, 32, 16
    x = jax.random.normal(k_x, (batch, input_size), jnp.float32)
    params = init_params(k_p, input_size, hidden_size, num_classes)

    prep = prepare_params(params)   # one-time cast/pad, outside the hot path
    out = neural_net_forward(x, prep)
    out = jax.block_until_ready(out)

    # Pure-JAX f32 reference (kernel uses bf16 matmul operands with f32
    # accumulation, so compare with a correspondingly loose tolerance).
    def ref(x, p):
        h = jnp.maximum(x @ p["w1"] + p["b1"], 0.0)
        h = jnp.maximum(h @ p["w2"] + p["b2"], 0.0)
        return h @ p["w3"] + p["b3"]

    ref_out = ref(x, params)
    assert out.shape == (batch, num_classes)
    max_err = float(jnp.max(jnp.abs(out - ref_out)))
    assert jnp.allclose(out, ref_out, atol=5e-2, rtol=5e-2), max_err

    print("KERNEL_OK")
</pallas_src>

<mosaic_0001>
module attributes {stable_mosaic.version = 11 : i64} {
  func.func @mlp_kernel(%arg0: i32, %arg1: memref<8x32xf32, #tpu.memory_space<vmem>>, %arg2: memref<32x32xbf16, #tpu.memory_space<vmem>>, %arg3: memref<1x32xf32, #tpu.memory_space<vmem>>, %arg4: memref<32x32xbf16, #tpu.memory_space<vmem>>, %arg5: memref<1x32xf32, #tpu.memory_space<vmem>>, %arg6: memref<32x128xbf16, #tpu.memory_space<vmem>>, %arg7: memref<1x128xf32, #tpu.memory_space<vmem>>, %arg8: memref<8x128xf32, #tpu.memory_space<vmem>>) attributes {dimension_semantics = [#tpu.dimension_semantics<parallel>], iteration_bounds = array<i64: 1>, scalar_prefetch = 0 : i64, scratch_operands = 0 : i64, tpu.core_type = #tpu.core_type<tc>, window_params = [{transform_indices = @transform_0, window_bounds = array<i64: 8, 32>}, {pipeline_mode = #tpu.pipeline_mode<synchronous>, transform_indices = @transform_1, window_bounds = array<i64: 32, 32>}, {pipeline_mode = #tpu.pipeline_mode<synchronous>, transform_indices = @transform_2, window_bounds = array<i64: 1, 32>}, {pipeline_mode = #tpu.pipeline_mode<synchronous>, transform_indices = @transform_3, window_bounds = array<i64: 32, 32>}, {pipeline_mode = #tpu.pipeline_mode<synchronous>, transform_indices = @transform_4, window_bounds = array<i64: 1, 32>}, {pipeline_mode = #tpu.pipeline_mode<synchronous>, transform_indices = @transform_5, window_bounds = array<i64: 32, 128>}, {pipeline_mode = #tpu.pipeline_mode<synchronous>, transform_indices = @transform_6, window_bounds = array<i64: 1, 128>}, {transform_indices = @transform_7, window_bounds = array<i64: 8, 128>}]} {
    %c0 = arith.constant 0 : index
    %c0_0 = arith.constant 0 : index
    %0 = vector.load %arg1[%c0, %c0_0] : memref<8x32xf32, #tpu.memory_space<vmem>>, vector<8x32xf32>
    %1 = arith.truncf %0 : vector<8x32xf32> to vector<8x32xbf16>
    %c0_1 = arith.constant 0 : index
    %c0_2 = arith.constant 0 : index
    %2 = vector.load %arg2[%c0_1, %c0_2] : memref<32x32xbf16, #tpu.memory_space<vmem>>, vector<32x32xbf16>
    %cst = arith.constant dense<0.000000e+00> : vector<8x32xf32>
    %3 = tpu.matmul %1, %2, %cst {dimension_numbers = #tpu.dot_dimension_numbers<[1], [0], [0], [1], [0, 0, 1, 1], [], []>} : vector<8x32xbf16>, vector<32x32xbf16>, vector<8x32xf32> -> vector<8x32xf32>
    %c0_3 = arith.constant 0 : index
    %c0_4 = arith.constant 0 : index
    %4 = vector.load %arg3[%c0_3, %c0_4] : memref<1x32xf32, #tpu.memory_space<vmem>>, vector<1x32xf32>
    %5 = vector.broadcast %4 : vector<1x32xf32> to vector<8x32xf32>
    %6 = arith.addf %3, %5 : vector<8x32xf32>
    %cst_5 = arith.constant 0.000000e+00 : f32
    %7 = vector.broadcast %cst_5 : f32 to vector<8x32xf32>
    %8 = arith.maximumf %6, %7 : vector<8x32xf32>
    %9 = arith.truncf %8 : vector<8x32xf32> to vector<8x32xbf16>
    %c0_6 = arith.constant 0 : index
    %c0_7 = arith.constant 0 : index
    %10 = vector.load %arg4[%c0_6, %c0_7] : memref<32x32xbf16, #tpu.memory_space<vmem>>, vector<32x32xbf16>
    %cst_8 = arith.constant dense<0.000000e+00> : vector<8x32xf32>
    %11 = tpu.matmul %9, %10, %cst_8 {dimension_numbers = #tpu.dot_dimension_numbers<[1], [0], [0], [1], [0, 0, 1, 1], [], []>} : vector<8x32xbf16>, vector<32x32xbf16>, vector<8x32xf32> -> vector<8x32xf32>
    %c0_9 = arith.constant 0 : index
    %c0_10 = arith.constant 0 : index
    %12 = vector.load %arg5[%c0_9, %c0_10] : memref<1x32xf32, #tpu.memory_space<vmem>>, vector<1x32xf32>
    %13 = vector.broadcast %12 : vector<1x32xf32> to vector<8x32xf32>
    %14 = arith.addf %11, %13 : vector<8x32xf32>
    %cst_11 = arith.constant 0.000000e+00 : f32
    %15 = vector.broadcast %cst_11 : f32 to vector<8x32xf32>
    %16 = arith.maximumf %14, %15 : vector<8x32xf32>
    %17 = arith.truncf %16 : vector<8x32xf32> to vector<8x32xbf16>
    %c0_12 = arith.constant 0 : index
    %c0_13 = arith.constant 0 : index
    %18 = vector.load %arg6[%c0_12, %c0_13] : memref<32x128xbf16, #tpu.memory_space<vmem>>, vector<32x128xbf16>
    %cst_14 = arith.constant dense<0.000000e+00> : vector<8x128xf32>
    %19 = tpu.matmul %17, %18, %cst_14 {dimension_numbers = #tpu.dot_dimension_numbers<[1], [0], [0], [1], [0, 0, 1, 1], [], []>} : vector<8x32xbf16>, vector<32x128xbf16>, vector<8x128xf32> -> vector<8x128xf32>
    %c0_15 = arith.constant 0 : index
    %c0_16 = arith.constant 0 : index
    %20 = vector.load %arg7[%c0_15, %c0_16] : memref<1x128xf32, #tpu.memory_space<vmem>>, vector<1x128xf32>
    %21 = vector.broadcast %20 : vector<1x128xf32> to vector<8x128xf32>
    %22 = arith.addf %19, %21 : vector<8x128xf32>
    %c0_17 = arith.constant 0 : index
    %c0_18 = arith.constant 0 : index
    %23 = vector.load %arg8[%c0_17, %c0_18] : memref<8x128xf32, #tpu.memory_space<vmem>>, vector<8x128xf32>
    tpu.vector_store %arg8[%c0_17, %c0_18], %22 {strides = array<i32>} : memref<8x128xf32, #tpu.memory_space<vmem>>, vector<8x128xf32>,
    return
  }
  func.func @transform_0(%arg0: i32) -> (i32, i32) {
    %c0_i32 = arith.constant 0 : i32
    %c0_i32_0 = arith.constant 0 : i32
    return %arg0, %c0_i32 : i32, i32
  }
  func.func @transform_1(%arg0: i32) -> (i32, i32) {
    %c0_i32 = arith.constant 0 : i32
    %c0_i32_0 = arith.constant 0 : i32
    %c0_i32_1 = arith.constant 0 : i32
    return %c0_i32, %c0_i32_0 : i32, i32
  }
  func.func @transform_2(%arg0: i32) -> (i32, i32) {
    %c0_i32 = arith.constant 0 : i32
    %c0_i32_0 = arith.constant 0 : i32
    %c0_i32_1 = arith.constant 0 : i32
    return %c0_i32, %c0_i32_0 : i32, i32
  }
  func.func @transform_3(%arg0: i32) -> (i32, i32) {
    %c0_i32 = arith.constant 0 : i32
    %c0_i32_0 = arith.constant 0 : i32
    %c0_i32_1 = arith.constant 0 : i32
    return %c0_i32, %c0_i32_0 : i32, i32
  }
  func.func @transform_4(%arg0: i32) -> (i32, i32) {
    %c0_i32 = arith.constant 0 : i32
    %c0_i32_0 = arith.constant 0 : i32
    %c0_i32_1 = arith.constant 0 : i32
    return %c0_i32, %c0_i32_0 : i32, i32
  }
  func.func @transform_5(%arg0: i32) -> (i32, i32) {
    %c0_i32 = arith.constant 0 : i32
    %c0_i32_0 = arith.constant 0 : i32
    %c0_i32_1 = arith.constant 0 : i32
    return %c0_i32, %c0_i32_0 : i32, i32
  }
  func.func @transform_6(%arg0: i32) -> (i32, i32) {
    %c0_i32 = arith.constant 0 : i32
    %c0_i32_0 = arith.constant 0 : i32
    %c0_i32_1 = arith.constant 0 : i32
    return %c0_i32, %c0_i32_0 : i32, i32
  }
  func.func @transform_7(%arg0: i32) -> (i32, i32) {
    %c0_i32 = arith.constant 0 : i32
    %c0_i32_0 = arith.constant 0 : i32
    return %arg0, %c0_i32 : i32, i32
  }
}

module attributes {stable_mosaic.version = 11 : i64} {
  func.func @mlp_kernel(%arg0: i32, %arg1: memref<8x32xf32, #tpu.memory_space<vmem>>, %arg2: memref<32x32xbf16, #tpu.memory_space<vmem>>, %arg3: memref<1x32xf32, #tpu.memory_space<vmem>>, %arg4: memref<32x32xbf16, #tpu.memory_space<vmem>>, %arg5: memref<1x32xf32, #tpu.memory_space<vmem>>, %arg6: memref<32x128xbf16, #tpu.memory_space<vmem>>, %arg7: memref<1x128xf32, #tpu.memory_space<vmem>>, %arg8: memref<8x128xf32, #tpu.memory_space<vmem>>) attributes {dimension_semantics = [#tpu.dimension_semantics<parallel>], iteration_bounds = array<i64: 1>, scalar_prefetch = 0 : i64, scratch_operands = 0 : i64, tpu.core_type = #tpu.core_type<tc>, window_params = [{transform_indices = @transform_0, window_bounds = array<i64: 8, 32>}, {pipeline_mode = #tpu.pipeline_mode<synchronous>, transform_indices = @transform_1, window_bounds = array<i64: 32, 32>}, {pipeline_mode = #tpu.pipeline_mode<synchronous>, transform_indices = @transform_2, window_bounds = array<i64: 1, 32>}, {pipeline_mode = #tpu.pipeline_mode<synchronous>, transform_indices = @transform_3, window_bounds = array<i64: 32, 32>}, {pipeline_mode = #tpu.pipeline_mode<synchronous>, transform_indices = @transform_4, window_bounds = array<i64: 1, 32>}, {pipeline_mode = #tpu.pipeline_mode<synchronous>, transform_indices = @transform_5, window_bounds = array<i64: 32, 128>}, {pipeline_mode = #tpu.pipeline_mode<synchronous>, transform_indices = @transform_6, window_bounds = array<i64: 1, 128>}, {transform_indices = @transform_7, window_bounds = array<i64: 8, 128>}]} {
    %c0 = arith.constant 0 : index
    %c0_0 = arith.constant 0 : index
    %0 = vector.load %arg1[%c0, %c0_0] : memref<8x32xf32, #tpu.memory_space<vmem>>, vector<8x32xf32>
    %1 = arith.truncf %0 : vector<8x32xf32> to vector<8x32xbf16>
    %c0_1 = arith.constant 0 : index
    %c0_2 = arith.constant 0 : index
    %2 = vector.load %arg2[%c0_1, %c0_2] : memref<32x32xbf16, #tpu.memory_space<vmem>>, vector<32x32xbf16>
    %cst = arith.constant dense<0.000000e+00> : vector<8x32xf32>
    %3 = tpu.matmul %1, %2, %cst {dimension_numbers = #tpu.dot_dimension_numbers<[1], [0], [0], [1], [0, 0, 1, 1], [], []>} : vector<8x32xbf16>, vector<32x32xbf16>, vector<8x32xf32> -> vector<8x32xf32>
    %c0_3 = arith.constant 0 : index
    %c0_4 = arith.constant 0 : index
    %4 = vector.load %arg3[%c0_3, %c0_4] : memref<1x32xf32, #tpu.memory_space<vmem>>, vector<1x32xf32>
    %5 = vector.broadcast %4 : vector<1x32xf32> to vector<8x32xf32>
    %6 = arith.addf %3, %5 : vector<8x32xf32>
    %cst_5 = arith.constant 0.000000e+00 : f32
    %7 = vector.broadcast %cst_5 : f32 to vector<8x32xf32>
    %8 = arith.maximumf %6, %7 : vector<8x32xf32>
    %9 = arith.truncf %8 : vector<8x32xf32> to vector<8x32xbf16>
    %c0_6 = arith.constant 0 : index
    %c0_7 = arith.constant 0 : index
    %10 = vector.load %arg4[%c0_6, %c0_7] : memref<32x32xbf16, #tpu.memory_space<vmem>>, vector<32x32xbf16>
    %cst_8 = arith.constant dense<0.000000e+00> : vector<8x32xf32>
    %11 = tpu.matmul %9, %10, %cst_8 {dimension_numbers = #tpu.dot_dimension_numbers<[1], [0], [0], [1], [0, 0, 1, 1], [], []>} : vector<8x32xbf16>, vector<32x32xbf16>, vector<8x32xf32> -> vector<8x32xf32>
    %c0_9 = arith.constant 0 : index
    %c0_10 = arith.constant 0 : index
    %12 = vector.load %arg5[%c0_9, %c0_10] : memref<1x32xf32, #tpu.memory_space<vmem>>, vector<1x32xf32>
    %13 = vector.broadcast %12 : vector<1x32xf32> to vector<8x32xf32>
    %14 = arith.addf %11, %13 : vector<8x32xf32>
    %cst_11 = arith.constant 0.000000e+00 : f32
    %15 = vector.broadcast %cst_11 : f32 to vector<8x32xf32>
    %16 = arith.maximumf %14, %15 : vector<8x32xf32>
    %17 = arith.truncf %16 : vector<8x32xf32> to vector<8x32xbf16>
    %c0_12 = arith.constant 0 : index
    %c0_13 = arith.constant 0 : index
    %18 = vector.load %arg6[%c0_12, %c0_13] : memref<32x128xbf16, #tpu.memory_space<vmem>>, vector<32x128xbf16>
    %cst_14 = arith.constant dense<0.000000e+00> : vector<8x128xf32>
    %19 = tpu.matmul %17, %18, %cst_14 {dimension_numbers = #tpu.dot_dimension_numbers<[1], [0], [0], [1], [0, 0, 1, 1], [], []>} : vector<8x32xbf16>, vector<32x128xbf16>, vector<8x128xf32> -> vector<8x128xf32>
    %c0_15 = arith.constant 0 : index
    %c0_16 = arith.constant 0 : index
    %20 = vector.load %arg7[%c0_15, %c0_16] : memref<1x128xf32, #tpu.memory_space<vmem>>, vector<1x128xf32>
    %21 = vector.broadcast %20 : vector<1x128xf32> to vector<8x128xf32>
    %22 = arith.addf %19, %21 : vector<8x128xf32>
    %c0_17 = arith.constant 0 : index
    %c0_18 = arith.constant 0 : index
    %23 = vector.load %arg8[%c0_17, %c0_18] : memref<8x128xf32, #tpu.memory_space<vmem>>, vector<8x128xf32>
    tpu.vector_store %arg8[%c0_17, %c0_18], %22 {strides = array<i32>} : memref<8x128xf32, #tpu.memory_space<vmem>>, vector<8x128xf32>,
    return
  }
  func.func @transform_0(%arg0: i32) -> (i32, i32) {
    %c0_i32 = arith.constant 0 : i32
    %c0_i32_0 = arith.constant 0 : i32
    return %arg0, %c0_i32 : i32, i32
  }
  func.func @transform_1(%arg0: i32) -> (i32, i32) {
    %c0_i32 = arith.constant 0 : i32
    %c0_i32_0 = arith.constant 0 : i32
    %c0_i32_1 = arith.constant 0 : i32
    return %c0_i32, %c0_i32_0 : i32, i32
  }
  func.func @transform_2(%arg0: i32) -> (i32, i32) {
    %c0_i32 = arith.constant 0 : i32
    %c0_i32_0 = arith.constant 0 : i32
    %c0_i32_1 = arith.constant 0 : i32
    return %c0_i32, %c0_i32_0 : i32, i32
  }
  func.func @transform_3(%arg0: i32) -> (i32, i32) {
    %c0_i32 = arith.constant 0 : i32
    %c0_i32_0 = arith.constant 0 : i32
    %c0_i32_1 = arith.constant 0 : i32
    return %c0_i32, %c0_i32_0 : i32, i32
  }
  func.func @transform_4(%arg0: i32) -> (i32, i32) {
    %c0_i32 = arith.constant 0 : i32
    %c0_i32_0 = arith.constant 0 : i32
    %c0_i32_1 = arith.constant 0 : i32
    return %c0_i32, %c0_i32_0 : i32, i32
  }
  func.func @transform_5(%arg0: i32) -> (i32, i32) {
    %c0_i32 = arith.constant 0 : i32
    %c0_i32_0 = arith.constant 0 : i32
    %c0_i32_1 = arith.constant 0 : i32
    return %c0_i32, %c0_i32_0 : i32, i32
  }
  func.func @transform_6(%arg0: i32) -> (i32, i32) {
    %c0_i32 = arith.constant 0 : i32
    %c0_i32_0 = arith.constant 0 : i32
    %c0_i32_1 = arith.constant 0 : i32
    return %c0_i32, %c0_i32_0 : i32, i32
  }
  func.func @transform_7(%arg0: i32) -> (i32, i32) {
    %c0_i32 = arith.constant 0 : i32
    %c0_i32_0 = arith.constant 0 : i32
    return %arg0, %c0_i32 : i32, i32
  }
}

</mosaic_0001>

<bundles_post_ra>
// kernel: tpu_custom_call.1
= control target key start
LH: loop header
LB: loop body
LE: loop exit
PB: predicated region body
PF: predicated region fallthrough
CT: control target
= control target key end

     0   :  { %12 = vsyncpa [#allocation3], 0  ;;  %s562_s0 = inlined_call_operand.hbm [shape: f32[8,32], index: 0, kind: input, shape index: {}]   ;;  %s563_s1 = inlined_call_operand.hbm [shape: bf16[32,32], index: 1, kind: input, shape index: {}]   ;;  %s564_s2 = inlined_call_operand.vmem [shape: f32[1,32], index: 2, kind: input, shape index: {}]   ;;  %s565_s3 = inlined_call_operand.hbm [shape: bf16[32,32], index: 3, kind: input, shape index: {}]   ;;  %s566_s4 = inlined_call_operand.vmem [shape: f32[1,32], index: 4, kind: input, shape index: {}]   ;;  %s567_s5 = inlined_call_operand.vmem [shape: bf16[32,128], index: 5, kind: input, shape index: {}]   ;;  %s568_s6 = inlined_call_operand.vmem [shape: f32[1,128], index: 6, kind: input, shape index: {}]   ;;  %s569_s7 = inlined_call_operand.hbm [shape: f32[8,128], index: 7, kind: output, shape index: {}]  }
   0x1   :  { %13 = vsyncpa [#allocation6], 0 }
   0x2   :  { %14 = vsyncpa [#allocation4], 0  ;;  %s442_s24 = smov [#allocation5]   ;;  %s348_s28 = scalar_lea.hbm %s563_s1, 256 }
   0x3   :  { %s30_s25 = sshll.u32 %s442_s24, 4  ;;  %p349_p0 = scmp.ne.s32.totalorder %s563_s1, %s348_s28  ;;  %s31_s25 = int_to_ptr.vmem [resolvable:$true] %s30_s25 }
   0x4   :  { %p352_p1 = scmp.lt.u32.totalorder %s348_s28, %s563_s1 }
   0x6   :  { %p354_p2 = pnand %p352_p1, %p349_p0 }
   0x8   :  { %357 = shalt.err (!%p354_p2)
}
   0x9   :  { %s358_s10 = scalar_lea.vmem %s31_s25, 256  ;;  %p363_p4 = scmp.lt.s32.totalorder %s31_s25, %s31_s25 }
   0xa   :  { %p359_p3 = scmp.ne.s32.totalorder %s31_s25, %s358_s10  ;;  %p364_p5 = scmp.lt.s32.totalorder %s358_s10, %s358_s10 }
   0xc   :  { %p365_p6 = por %p364_p5, %p363_p4 }
   0xe   :  { %p366_p7 = pnand %p365_p6, %p359_p3 }
  0x10   :  { %369 = shalt.err (!%p366_p7)
}
  0x11   :  { %s443_s11 = smov 64   ;;  %s444_s12 = smov 4  }
  0x12   :  { %36 = dma.hbm_to_vmem [thread:$0]  %s563_s1, 256, %s31_s25, [#allocation6], %s443_s11, %s443_s11, %s444_s12  }
  0x13   :  { %s445_s15 = smov [#allocation2]   ;;  %s446_s17 = smov [#allocation7]  }
  0x14   :  { %s21_s16 = sshll.u32 %s445_s15, 4  ;;  %s44_s18 = sshll.u32 %s446_s17, 4  ;;  %s22_s16 = int_to_ptr.vmem [resolvable:$true] %s21_s16  ;;  %s45_s18 = int_to_ptr.vmem [resolvable:$true] %s44_s18 }
  0x15   :  { %s370_s21 = scalar_lea.hbm %s562_s0, 128 }
  0x16   :  { %p371_p8 = scmp.ne.s32.totalorder %s562_s0, %s370_s21  ;;  %p374_p9 = scmp.lt.u32.totalorder %s370_s21, %s562_s0 }
  0x18   :  { %p376_p10 = pnand %p374_p9, %p371_p8 }
  0x1a   :  { %379 = shalt.err (!%p376_p10)
}
  0x1b   :  { %s380_s1 = scalar_lea.vmem %s22_s16, 128  ;;  %p385_p12 = scmp.lt.s32.totalorder %s22_s16, %s22_s16 }
  0x1c   :  { %p381_p11 = scmp.ne.s32.totalorder %s22_s16, %s380_s1  ;;  %p386_p13 = scmp.lt.s32.totalorder %s380_s1, %s380_s1 }
  0x1e   :  { %p387_p0 = por %p386_p13, %p385_p12 }
  0x20   :  { %p388_p1 = pnand %p387_p0, %p381_p11 }
  0x22   :  { %391 = shalt.err (!%p388_p1)
}
  0x23   :  { %24 = dma.hbm_to_vmem [thread:$0]  %s562_s0, 128, %s22_s16, [#allocation3]  }
  0x24   :  { %s392_s30 = scalar_lea.hbm %s565_s3, 256 }
  0x25   :  { %p393_p2 = scmp.ne.s32.totalorder %s565_s3, %s392_s30  ;;  %p396_p3 = scmp.lt.u32.totalorder %s392_s30, %s565_s3 }
  0x27   :  { %p398_p4 = pnand %p396_p3, %p393_p2 }
  0x29   :  { %401 = shalt.err (!%p398_p4)
}
  0x2a   :  { %s402_s14 = scalar_lea.vmem %s45_s18, 256  ;;  %p407_p6 = scmp.lt.s32.totalorder %s45_s18, %s45_s18 }
  0x2b   :  { %p403_p5 = scmp.ne.s32.totalorder %s45_s18, %s402_s14  ;;  %p408_p7 = scmp.lt.s32.totalorder %s402_s14, %s402_s14 }
  0x2d   :  { %p409_p8 = por %p408_p7, %p407_p6 }
  0x2f   :  { %p410_p9 = pnand %p409_p8, %p403_p5 }
  0x31   :  { %413 = shalt.err (!%p410_p9)
}
  0x32   :  { %50 = dma.hbm_to_vmem [thread:$0]  %s565_s3, 256, %s45_s18, [#allocation6], %s443_s11, %s443_s11, %s444_s12  }
  0x33   :  { %436 = dma.done.wait [#allocation3], 128  }
  0x34   :  { %437 = vsyncadd [#allocation3], 4294967168 }
  0x35   :  { %438 = dma.done.wait [#allocation6], 512  }
  0x36   :  { %439 = vsyncadd [#allocation6], 4294966784  ;;  %v447_v0 = vmov 0.0   ;;  %vm448_vm0 = vmmov 0   ;;  %v342_v1 = vld [vmem:[#allocation5] sm:$0xff]   ;;  %v343_v2 = vld [vmem:[#allocation5 + $0x8] sm:$0xff]  }
  0x37   :  { %310 = vmatprep.subr.bf16.mxu0 %v447_v0  ;;  %314 = vmatprep.mubr.msk.bf16.mxu0 %vm448_vm0, %v447_v0  ;;  %v67_v3 = vld [vmem:[#allocation2] sm:$0xff]  ;;  %vm92_vm1 = vcmask 261120   ;;  %v344_v5 = vld [vmem:[#allocation7] sm:$0xff]   ;;  %v346_v7 = vld [vmem:[%s567_s5] sm:$0xff]   ;;  %s449_s22 = smov [#allocation8]  }
  0x38   :  { %318 = vmatprep.subr.bf16.mxu1 %v447_v0  ;;  %322 = vmatprep.mubr.msk.bf16.mxu1 %vm448_vm0, %v447_v0  ;;  %v68_v4 = vpack.c.bf16 %v67_v3, %v67_v3  ;;  %v345_v6 = vld [vmem:[#allocation7 + $0x8] sm:$0xff]   ;;  %v289_v8 = vld [vmem:[%s564_s2] ss:$0 sm:$0xff]  ;;  %v347_v16 = vld [vmem:[%s567_s5 + $0x8] sm:$0xff]   ;;  %s279_s5 = sshll.u32 %s449_s22, 4  ;;  %s280_s5 = int_to_ptr.vmem [resolvable:$true] %s279_s5 }
  0x39   :  { %311 = vmatpush3.bf16.msra.mxu0 %v342_v1  ;;  %319 = vmatpush3.bf16.msra.mxu1 %v344_v5  ;;  %v293_v17 = vld [vmem:[%s566_s4] ss:$0 sm:$0xff]  ;;  %s414_s4 = scalar_lea.vmem %s280_s5, 128  ;;  %p419_p11 = scmp.lt.s32.totalorder %s280_s5, %s280_s5 }
  0x3a   :  { %312 = vmatprep.subr.bf16.mxu0 %v447_v0  ;;  %320 = vmatprep.subr.bf16.mxu1 %v447_v0  ;;  %v297_v25 = vld [vmem:[%s568_s6] ss:$0 sm:$0xff]  ;;  %p415_p10 = scmp.ne.s32.totalorder %s280_s5, %s414_s4  ;;  %p420_p12 = scmp.lt.s32.totalorder %s414_s4, %s414_s4 }
  0x3c   :  { %p421_p13 = por %p420_p12, %p419_p11 }
  0x3d   :  { %313 = vmatpush3.bf16.msra.mxu0 %v343_v2  ;;  %321 = vmatpush3.bf16.msra.mxu1 %v345_v6 }
  0x3e   :  { %326 = vmatprep.subr.bf16.mxu0 %v447_v0  ;;  %p422_p0 = pnand %p421_p13, %p415_p10 }
  0x40   :  { %315 = vmatmul.mubr.msk.bf16.vlgmr.msra.gmra.mrb[0].mxu0 %vm92_vm1, %v68_v4 }
  0x41   :  { %330 = vmatprep.mubr.msk.bf16.mxu0 %vm448_vm0, %v447_v0  ;;  %327 = vmatpush3.bf16.msra.mxu0 %v346_v7 }
  0x42   :  { %328 = vmatprep.subr.bf16.mxu0 %v447_v0 }
  0x45   :  { %329 = vmatpush3.bf16.msra.mxu0 %v347_v16 }
 0x113   :  { %v130_v9 = vpop.f32.mrb[0].mxu0 }
 0x114   :  { %v131_v10 = vadd.f32 %v289_v8, %v130_v9  ;;  %v316_v11 = vpop.f32.mrb[1].mxu0 }
 0x115   :  { %v133_v12 = vpop.f32.mrb[2].mxu0 }
 0x116   :  { %v136_v13 = vmax.f32 %v131_v10, 0.0  ;;  %v317_v14 = vpop.f32.mrb[3].mxu0 }
 0x118   :  { %v137_v15 = vpack.c.bf16 %v136_v13, %v136_v13 }
 0x11a   :  { %323 = vmatmul.mubr.msk.bf16.vlgmr.msra.gmra.mrb[0].mxu1 %vm92_vm1, %v137_v15 }
 0x1ed   :  { %v198_v18 = vpop.f32.mrb[0].mxu1 }
 0x1ee   :  { %v199_v19 = vadd.f32 %v293_v17, %v198_v18  ;;  %v324_v20 = vpop.f32.mrb[1].mxu1 }
 0x1ef   :  { %v201_v21 = vpop.f32.mrb[2].mxu1 }
 0x1f0   :  { %v204_v22 = vmax.f32 %v199_v19, 0.0  ;;  %v325_v23 = vpop.f32.mrb[3].mxu1 }
 0x1f2   :  { %v205_v24 = vpack.c.bf16 %v204_v22, %v204_v22 }
 0x1f4   :  { %331 = vmatmul.mubr.msk.bf16.vlgmr.msra.gmra.mrb[4].mxu0 %vm92_vm1, %v205_v24 }
 0x2c7   :  { %v266_v26 = vpop.f32.mrb[4].mxu0 }
 0x2c8   :  { %v267_v27 = vadd.f32 %v297_v25, %v266_v26  ;;  %v332_v28 = vpop.f32.mrb[5].mxu0 }
 0x2c9   :  { %v269_v29 = vpop.f32.mrb[6].mxu0 }
 0x2ca   :  { %272 = vst [vmem:[#allocation8] sm:$0xff] %v267_v27  ;;  %v333_v30 = vpop.f32.mrb[7].mxu0 }
 0x2cb   :  { %425 = shalt.err (!%p422_p0)
}
 0x2cc   :  { %s426_s6 = scalar_lea.hbm %s569_s7, 128 }
 0x2cd   :  { %p427_p1 = scmp.ne.s32.totalorder %s569_s7, %s426_s6  ;;  %p430_p2 = scmp.lt.u32.totalorder %s426_s6, %s569_s7 }
 0x2cf   :  { %p432_p3 = pnand %p430_p2, %p427_p1 }
 0x2d1   :  { %435 = shalt.err (!%p432_p3)
}
 0x2d2   :  { %282 = dma.vmem_to_hbm [thread:$0]  %s280_s5, 128, %s569_s7, [#allocation4]  }
 0x2d3   :  { %440 = dma.done.wait [#allocation4], 128  }
 0x2d4   :  { %441 = vsyncadd [#allocation4], 4294967168 }
 0x2d5   :  { %286 = vsyncpa [#allocation3], 1 }
 0x2d6   :  { %287 = vsyncpa [#allocation6], 1 }
 0x2d7   :  { %288 = vsyncpa [#allocation4], 1 }

// kernel: tpu_custom_call.1
= control target key start
LH: loop header
LB: loop body
LE: loop exit
PB: predicated region body
PF: predicated region fallthrough
CT: control target
= control target key end

     0   :  { %12 = vsyncpa [#allocation3], 0  ;;  %s562_s0 = inlined_call_operand.hbm [shape: f32[8,32], index: 0, kind: input, shape index: {}]   ;;  %s563_s1 = inlined_call_operand.hbm [shape: bf16[32,32], index: 1, kind: input, shape index: {}]   ;;  %s564_s2 = inlined_call_operand.vmem [shape: f32[1,32], index: 2, kind: input, shape index: {}]   ;;  %s565_s3 = inlined_call_operand.hbm [shape: bf16[32,32], index: 3, kind: input, shape index: {}]   ;;  %s566_s4 = inlined_call_operand.vmem [shape: f32[1,32], index: 4, kind: input, shape index: {}]   ;;  %s567_s5 = inlined_call_operand.vmem [shape: bf16[32,128], index: 5, kind: input, shape index: {}]   ;;  %s568_s6 = inlined_call_operand.vmem [shape: f32[1,128], index: 6, kind: input, shape index: {}]   ;;  %s569_s7 = inlined_call_operand.hbm [shape: f32[8,128], index: 7, kind: output, shape index: {}]  }
   0x1   :  { %13 = vsyncpa [#allocation6], 0 }
   0x2   :  { %14 = vsyncpa [#allocation4], 0  ;;  %s442_s24 = smov [#allocation5]   ;;  %s348_s28 = scalar_lea.hbm %s563_s1, 256 }
   0x3   :  { %s30_s25 = sshll.u32 %s442_s24, 4  ;;  %p349_p0 = scmp.ne.s32.totalorder %s563_s1, %s348_s28  ;;  %s31_s25 = int_to_ptr.vmem [resolvable:$true] %s30_s25 }
   0x4   :  { %p352_p1 = scmp.lt.u32.totalorder %s348_s28, %s563_s1 }
   0x6   :  { %p354_p2 = pnand %p352_p1, %p349_p0 }
   0x8   :  { %357 = shalt.err (!%p354_p2)
}
   0x9   :  { %s358_s10 = scalar_lea.vmem %s31_s25, 256  ;;  %p363_p4 = scmp.lt.s32.totalorder %s31_s25, %s31_s25 }
   0xa   :  { %p359_p3 = scmp.ne.s32.totalorder %s31_s25, %s358_s10  ;;  %p364_p5 = scmp.lt.s32.totalorder %s358_s10, %s358_s10 }
   0xc   :  { %p365_p6 = por %p364_p5, %p363_p4 }
   0xe   :  { %p366_p7 = pnand %p365_p6, %p359_p3 }
  0x10   :  { %369 = shalt.err (!%p366_p7)
}
  0x11   :  { %s443_s11 = smov 64   ;;  %s444_s12 = smov 4  }
  0x12   :  { %36 = dma.hbm_to_vmem [thread:$0]  %s563_s1, 256, %s31_s25, [#allocation6], %s443_s11, %s443_s11, %s444_s12  }
  0x13   :  { %s445_s15 = smov [#allocation2]   ;;  %s446_s17 = smov [#allocation7]  }
  0x14   :  { %s21_s16 = sshll.u32 %s445_s15, 4  ;;  %s44_s18 = sshll.u32 %s446_s17, 4  ;;  %s22_s16 = int_to_ptr.vmem [resolvable:$true] %s21_s16  ;;  %s45_s18 = int_to_ptr.vmem [resolvable:$true] %s44_s18 }
  0x15   :  { %s370_s21 = scalar_lea.hbm %s562_s0, 128 }
  0x16   :  { %p371_p8 = scmp.ne.s32.totalorder %s562_s0, %s370_s21  ;;  %p374_p9 = scmp.lt.u32.totalorder %s370_s21, %s562_s0 }
  0x18   :  { %p376_p10 = pnand %p374_p9, %p371_p8 }
  0x1a   :  { %379 = shalt.err (!%p376_p10)
}
  0x1b   :  { %s380_s1 = scalar_lea.vmem %s22_s16, 128  ;;  %p385_p12 = scmp.lt.s32.totalorder %s22_s16, %s22_s16 }
  0x1c   :  { %p381_p11 = scmp.ne.s32.totalorder %s22_s16, %s380_s1  ;;  %p386_p13 = scmp.lt.s32.totalorder %s380_s1, %s380_s1 }
  0x1e   :  { %p387_p0 = por %p386_p13, %p385_p12 }
  0x20   :  { %p388_p1 = pnand %p387_p0, %p381_p11 }
  0x22   :  { %391 = shalt.err (!%p388_p1)
}
  0x23   :  { %24 = dma.hbm_to_vmem [thread:$0]  %s562_s0, 128, %s22_s16, [#allocation3]  }
  0x24   :  { %s392_s30 = scalar_lea.hbm %s565_s3, 256 }
  0x25   :  { %p393_p2 = scmp.ne.s32.totalorder %s565_s3, %s392_s30  ;;  %p396_p3 = scmp.lt.u32.totalorder %s392_s30, %s565_s3 }
  0x27   :  { %p398_p4 = pnand %p396_p3, %p393_p2 }
  0x29   :  { %401 = shalt.err (!%p398_p4)
}
  0x2a   :  { %s402_s14 = scalar_lea.vmem %s45_s18, 256  ;;  %p407_p6 = scmp.lt.s32.totalorder %s45_s18, %s45_s18 }
  0x2b   :  { %p403_p5 = scmp.ne.s32.totalorder %s45_s18, %s402_s14  ;;  %p408_p7 = scmp.lt.s32.totalorder %s402_s14, %s402_s14 }
  0x2d   :  { %p409_p8 = por %p408_p7, %p407_p6 }
  0x2f   :  { %p410_p9 = pnand %p409_p8, %p403_p5 }
  0x31   :  { %413 = shalt.err (!%p410_p9)
}
  0x32   :  { %50 = dma.hbm_to_vmem [thread:$0]  %s565_s3, 256, %s45_s18, [#allocation6], %s443_s11, %s443_s11, %s444_s12  }
  0x33   :  { %436 = dma.done.wait [#allocation3], 128  }
  0x34   :  { %437 = vsyncadd [#allocation3], 4294967168 }
  0x35   :  { %438 = dma.done.wait [#allocation6], 512  }
  0x36   :  { %439 = vsyncadd [#allocation6], 4294966784  ;;  %v447_v0 = vmov 0.0   ;;  %vm448_vm0 = vmmov 0   ;;  %v342_v1 = vld [vmem:[#allocation5] sm:$0xff]   ;;  %v343_v2 = vld [vmem:[#allocation5 + $0x8] sm:$0xff]  }
  0x37   :  { %310 = vmatprep.subr.bf16.mxu0 %v447_v0  ;;  %314 = vmatprep.mubr.msk.bf16.mxu0 %vm448_vm0, %v447_v0  ;;  %v67_v3 = vld [vmem:[#allocation2] sm:$0xff]  ;;  %vm92_vm1 = vcmask 261120   ;;  %v344_v5 = vld [vmem:[#allocation7] sm:$0xff]   ;;  %v346_v7 = vld [vmem:[%s567_s5] sm:$0xff]   ;;  %s449_s22 = smov [#allocation8]  }
  0x38   :  { %318 = vmatprep.subr.bf16.mxu1 %v447_v0  ;;  %322 = vmatprep.mubr.msk.bf16.mxu1 %vm448_vm0, %v447_v0  ;;  %v68_v4 = vpack.c.bf16 %v67_v3, %v67_v3  ;;  %v345_v6 = vld [vmem:[#allocation7 + $0x8] sm:$0xff]   ;;  %v289_v8 = vld [vmem:[%s564_s2] ss:$0 sm:$0xff]  ;;  %v347_v16 = vld [vmem:[%s567_s5 + $0x8] sm:$0xff]   ;;  %s279_s5 = sshll.u32 %s449_s22, 4  ;;  %s280_s5 = int_to_ptr.vmem [resolvable:$true] %s279_s5 }
  0x39   :  { %311 = vmatpush3.bf16.msra.mxu0 %v342_v1  ;;  %319 = vmatpush3.bf16.msra.mxu1 %v344_v5  ;;  %v293_v17 = vld [vmem:[%s566_s4] ss:$0 sm:$0xff]  ;;  %s414_s4 = scalar_lea.vmem %s280_s5, 128  ;;  %p419_p11 = scmp.lt.s32.totalorder %s280_s5, %s280_s5 }
  0x3a   :  { %312 = vmatprep.subr.bf16.mxu0 %v447_v0  ;;  %320 = vmatprep.subr.bf16.mxu1 %v447_v0  ;;  %v297_v25 = vld [vmem:[%s568_s6] ss:$0 sm:$0xff]  ;;  %p415_p10 = scmp.ne.s32.totalorder %s280_s5, %s414_s4  ;;  %p420_p12 = scmp.lt.s32.totalorder %s414_s4, %s414_s4 }
  0x3c   :  { %p421_p13 = por %p420_p12, %p419_p11 }
  0x3d   :  { %313 = vmatpush3.bf16.msra.mxu0 %v343_v2  ;;  %321 = vmatpush3.bf16.msra.mxu1 %v345_v6 }
  0x3e   :  { %326 = vmatprep.subr.bf16.mxu0 %v447_v0  ;;  %p422_p0 = pnand %p421_p13, %p415_p10 }
  0x40   :  { %315 = vmatmul.mubr.msk.bf16.vlgmr.msra.gmra.mrb[0].mxu0 %vm92_vm1, %v68_v4 }
  0x41   :  { %330 = vmatprep.mubr.msk.bf16.mxu0 %vm448_vm0, %v447_v0  ;;  %327 = vmatpush3.bf16.msra.mxu0 %v346_v7 }
  0x42   :  { %328 = vmatprep.subr.bf16.mxu0 %v447_v0 }
  0x45   :  { %329 = vmatpush3.bf16.msra.mxu0 %v347_v16 }
 0x113   :  { %v130_v9 = vpop.f32.mrb[0].mxu0 }
 0x114   :  { %v131_v10 = vadd.f32 %v289_v8, %v130_v9  ;;  %v316_v11 = vpop.f32.mrb[1].mxu0 }
 0x115   :  { %v133_v12 = vpop.f32.mrb[2].mxu0 }
 0x116   :  { %v136_v13 = vmax.f32 %v131_v10, 0.0  ;;  %v317_v14 = vpop.f32.mrb[3].mxu0 }
 0x118   :  { %v137_v15 = vpack.c.bf16 %v136_v13, %v136_v13 }
 0x11a   :  { %323 = vmatmul.mubr.msk.bf16.vlgmr.msra.gmra.mrb[0].mxu1 %vm92_vm1, %v137_v15 }
 0x1ed   :  { %v198_v18 = vpop.f32.mrb[0].mxu1 }
 0x1ee   :  { %v199_v19 = vadd.f32 %v293_v17, %v198_v18  ;;  %v324_v20 = vpop.f32.mrb[1].mxu1 }
 0x1ef   :  { %v201_v21 = vpop.f32.mrb[2].mxu1 }
 0x1f0   :  { %v204_v22 = vmax.f32 %v199_v19, 0.0  ;;  %v325_v23 = vpop.f32.mrb[3].mxu1 }
 0x1f2   :  { %v205_v24 = vpack.c.bf16 %v204_v22, %v204_v22 }
 0x1f4   :  { %331 = vmatmul.mubr.msk.bf16.vlgmr.msra.gmra.mrb[4].mxu0 %vm92_vm1, %v205_v24 }
 0x2c7   :  { %v266_v26 = vpop.f32.mrb[4].mxu0 }
 0x2c8   :  { %v267_v27 = vadd.f32 %v297_v25, %v266_v26  ;;  %v332_v28 = vpop.f32.mrb[5].mxu0 }
 0x2c9   :  { %v269_v29 = vpop.f32.mrb[6].mxu0 }
 0x2ca   :  { %272 = vst [vmem:[#allocation8] sm:$0xff] %v267_v27  ;;  %v333_v30 = vpop.f32.mrb[7].mxu0 }
 0x2cb   :  { %425 = shalt.err (!%p422_p0)
}
 0x2cc   :  { %s426_s6 = scalar_lea.hbm %s569_s7, 128 }
 0x2cd   :  { %p427_p1 = scmp.ne.s32.totalorder %s569_s7, %s426_s6  ;;  %p430_p2 = scmp.lt.u32.totalorder %s426_s6, %s569_s7 }
 0x2cf   :  { %p432_p3 = pnand %p430_p2, %p427_p1 }
 0x2d1   :  { %435 = shalt.err (!%p432_p3)
}
 0x2d2   :  { %282 = dma.vmem_to_hbm [thread:$0]  %s280_s5, 128, %s569_s7, [#allocation4]  }
 0x2d3   :  { %440 = dma.done.wait [#allocation4], 128  }
 0x2d4   :  { %441 = vsyncadd [#allocation4], 4294967168 }
 0x2d5   :  { %286 = vsyncpa [#allocation3], 1 }
 0x2d6   :  { %287 = vsyncpa [#allocation6], 1 }
 0x2d7   :  { %288 = vsyncpa [#allocation4], 1 }

</bundles_post_ra>
